<compile_context>
chip_gen: v6e
topology: v6e:2x2x1
jax: 0.10.0
libtpu: 0.0.40
codegen_flags: <defaults>
</compile_context>

<pallas_src>
import functools
import math

import jax
import jax.numpy as jnp
from jax.experimental import pallas as pl
from jax.experimental.pallas import tpu as pltpu

LANE = 128
ROW_TILE = 256                     # adj row tile (output rows), streaming path
COL_TILE = 512                     # adj column tile (reduction axis)
VMEM_LIMIT = 48 * 1024 * 1024      # safe on v5e/v6e (128 MiB) and v7x (64 MiB)
FUSED_VMEM_BUDGET = 36 * 1024 * 1024   # conservative (assumes double buffers)


def _round_up(x, m):
    return (x + m - 1) // m * m


def _fused_fits(n_p, f_in_p, f_p):
    """Conservative VMEM estimate for the fully-resident fused kernel."""
    managed = (2 * n_p * n_p          # adj  (bf16)
               + 4 * n_p * f_in_p     # feat (f32)
               + 4 * f_in_p * f_p     # W    (f32)
               + 4 * n_p * f_p        # acc  (f32 output)
               + 4 * n_p + 4 * f_p)   # norm + bias
    scratch = 2 * n_p * f_p           # y carrier (bf16, single buffer)
    return 2 * managed + scratch <= FUSED_VMEM_BUDGET


# ---------------------------------------------------------------------------
# Fused path: one pallas_call, grid=(k,).  Everything VMEM-resident.
# ---------------------------------------------------------------------------
def _fused_kernel(feat_ref, w_ref, b_ref, adj_ref, norm_ref, coef_ref,
                  acc_ref, y_ref):
    s = pl.program_id(0)

    @pl.when(s == 0)
    def _():
        # x0 = X @ W ; acc = x0 + (k+1)*b ; y = (x0 * norm) as bf16 carrier.
        x0 = jnp.dot(feat_ref[...], w_ref[...],
                     preferred_element_type=jnp.float32)
        acc_ref[...] = x0 + b_ref[...]
        y_ref[...] = (x0 * norm_ref[...]).astype(y_ref.dtype)

    norm = norm_ref[...]                                      # (n_p, 1) f32
    cur = norm * jnp.dot(adj_ref[...], y_ref[...],
                         preferred_element_type=jnp.float32)  # (n_p, Fp) f32
    acc_ref[...] += coef_ref[s] * cur
    y_ref[...] = (cur * norm).astype(y_ref.dtype)


# ---------------------------------------------------------------------------
# Streaming path kernels.
# ---------------------------------------------------------------------------
def _init_kernel(feat_ref, w_ref, b_ref, norm_ref, acc_ref, y_ref):
    """acc = (feat @ W) + (k+1)*b ;  y = (feat @ W) * norm   (bf16)."""
    x0 = jnp.dot(feat_ref[...], w_ref[...], preferred_element_type=jnp.float32)
    acc_ref[...] = x0 + b_ref[...]
    y_ref[...] = (x0 * norm_ref[...]).astype(y_ref.dtype)


def _prop_kernel(adj_ref, y_ref, norm_ref, acc_in_ref, coeff_ref,
                 acc_out_ref, y_next_ref, psum_ref):
    """One propagation step, tiled over (row tiles, adj column tiles).

    psum accumulates adj_tile @ y_tile over the column (reduction) axis; on
    the last column tile the left norm is applied once (hoisted out of the j
    loop), the weighted term is folded into the running accumulator and the
    right-normalized features for the next step are emitted in bf16.
    """
    j = pl.program_id(1)

    @pl.when(j == 0)
    def _():
        psum_ref[...] = jnp.zeros_like(psum_ref)

    psum_ref[...] += jnp.dot(adj_ref[...], y_ref[...],
                             preferred_element_type=jnp.float32)

    @pl.when(j == pl.num_programs(1) - 1)
    def _():
        norm = norm_ref[...]                          # (tm, 1) f32
        cur = norm * psum_ref[...]                    # (tm, Fp) f32
        acc_out_ref[...] = acc_in_ref[...] + coeff_ref[0] * cur
        y_next_ref[...] = (cur * norm).astype(y_next_ref.dtype)


# ---------------------------------------------------------------------------
# Wrapper.
# ---------------------------------------------------------------------------
@functools.partial(jax.jit, static_argnums=(6, 7))
def egconv_forward(adj, feat, norm, w, b, lam, k, force_stream=False):
    n, f_in = feat.shape
    f_out = w.shape[1]

    f_in_p = _round_up(f_in, LANE)
    f_p = _round_up(f_out, LANE)

    lam = jnp.asarray(lam, jnp.float32)
    # coeff_0 == 1 always; fold (k+1)*bias into the init term.
    if k >= 1:
        coeffs = jnp.stack(
            [lam ** i / jnp.float32(math.factorial(i)) for i in range(1, k + 1)])
    else:
        coeffs = None

    n_p_fused = _round_up(max(n, 1), LANE)
    use_fused = (not force_stream) and k >= 1 and _fused_fits(
        n_p_fused, f_in_p, f_p)

    # ---------------- fused, fully VMEM-resident path -----------------------
    if use_fused:
        n_p = n_p_fused
        adj_p = jnp.zeros((n_p, n_p), jnp.bfloat16).at[:n, :n].set(
            adj.astype(jnp.bfloat16))                 # 0/1 exact in bf16
        feat_p = jnp.zeros((n_p, f_in_p), jnp.float32).at[:n, :f_in].set(
            feat.astype(jnp.float32))
        norm_p = jnp.zeros((n_p, 1), jnp.float32).at[:n, :].set(
            norm.astype(jnp.float32))
        w_p = jnp.zeros((f_in_p, f_p), jnp.float32).at[:f_in, :f_out].set(
            w.astype(jnp.float32))
        b_p = jnp.zeros((1, f_p), jnp.float32).at[:, :f_out].set(
            b.astype(jnp.float32)) * jnp.float32(k + 1)

        fused_cost = pl.CostEstimate(
            flops=2 * n_p * f_in_p * f_p + 2 * k * n_p * n_p * f_p,
            transcendentals=0,
            bytes_accessed=2 * n_p * n_p + 4 * n_p * f_in_p
            + 4 * f_in_p * f_p + 4 * n_p * f_p + 4 * n_p + 4 * f_p)
        # TODO(synk): the fused path runs on a single TensorCore; very large
        # medium-size graphs fall back to the megacore-parallel streaming path.
        acc = pl.pallas_call(
            _fused_kernel,
            out_shape=jax.ShapeDtypeStruct((n_p, f_p), jnp.float32),
            grid=(k,),
            in_specs=[
                pl.BlockSpec((n_p, f_in_p), lambda s: (0, 0)),       # feat
                pl.BlockSpec((f_in_p, f_p), lambda s: (0, 0)),       # W
                pl.BlockSpec((1, f_p), lambda s: (0, 0)),            # (k+1)*b
                pl.BlockSpec((n_p, n_p), lambda s: (0, 0)),          # adj
                pl.BlockSpec((n_p, 1), lambda s: (0, 0)),            # norm
                pl.BlockSpec((k,), lambda s: (0,),
                             memory_space=pltpu.MemorySpace.SMEM),   # coeffs
            ],
            out_specs=pl.BlockSpec((n_p, f_p), lambda s: (0, 0)),    # acc
            scratch_shapes=[pltpu.VMEM((n_p, f_p), jnp.bfloat16)],   # y carrier
            compiler_params=pltpu.CompilerParams(
                dimension_semantics=("arbitrary",),
                vmem_limit_bytes=VMEM_LIMIT),
            cost_estimate=fused_cost,
        )(feat_p, w_p, b_p, adj_p, norm_p, coeffs)
        return acc[:n, :f_out]

    # ---------------- streaming (tiled, pipelined) path ----------------------
    if n <= COL_TILE:
        n_p = _round_up(n, LANE)
        tm = tk = n_p
    else:
        n_p = _round_up(n, COL_TILE)
        tm, tk = ROW_TILE, COL_TILE

    adj_p = jnp.zeros((n_p, n_p), jnp.bfloat16).at[:n, :n].set(
        adj.astype(jnp.bfloat16))
    feat_p = jnp.zeros((n_p, f_in_p), jnp.float32).at[:n, :f_in].set(
        feat.astype(jnp.float32))
    norm_p = jnp.zeros((n_p, 1), jnp.float32).at[:n, :].set(
        norm.astype(jnp.float32))
    w_p = jnp.zeros((f_in_p, f_p), jnp.float32).at[:f_in, :f_out].set(
        w.astype(jnp.float32))
    b_p = jnp.zeros((1, f_p), jnp.float32).at[:, :f_out].set(
        b.astype(jnp.float32)) * jnp.float32(k + 1)

    n_row = n_p // tm
    n_col = n_p // tk

    # Step 0: apply fc first (P^i(X W) == (P^i X) W).
    init_cost = pl.CostEstimate(
        flops=2 * n_p * f_in_p * f_p,
        transcendentals=0,
        bytes_accessed=4 * (n_p * f_in_p + f_in_p * f_p + n_p * f_p)
        + 2 * n_p * f_p)
    acc, y = pl.pallas_call(
        _init_kernel,
        out_shape=(jax.ShapeDtypeStruct((n_p, f_p), jnp.float32),
                   jax.ShapeDtypeStruct((n_p, f_p), jnp.bfloat16)),
        grid=(n_row,),
        in_specs=[
            pl.BlockSpec((tm, f_in_p), lambda i: (i, 0)),            # feat
            pl.BlockSpec((f_in_p, f_p), lambda i: (0, 0)),           # W
            pl.BlockSpec((1, f_p), lambda i: (0, 0)),                # (k+1)*b
            pl.BlockSpec((tm, 1), lambda i: (i, 0)),                 # norm
        ],
        out_specs=(pl.BlockSpec((tm, f_p), lambda i: (i, 0)),        # acc
                   pl.BlockSpec((tm, f_p), lambda i: (i, 0))),       # y
        compiler_params=pltpu.CompilerParams(
            dimension_semantics=("parallel",),
            vmem_limit_bytes=VMEM_LIMIT),
        cost_estimate=init_cost,
    )(feat_p, w_p, b_p, norm_p)

    if k == 0:
        return acc[:n, :f_out]

    # k propagation steps (recurrence => k sequential pipelined calls).
    prop_cost = pl.CostEstimate(
        flops=2 * n_p * n_p * f_p,
        transcendentals=0,
        bytes_accessed=2 * n_p * n_p + 2 * n_p * f_p          # adj + y (bf16)
        + 2 * 4 * n_p * f_p + 2 * n_p * f_p + 4 * n_p)        # acc io + y_next
    prop_call = pl.pallas_call(
        _prop_kernel,
        out_shape=(jax.ShapeDtypeStruct((n_p, f_p), jnp.float32),
                   jax.ShapeDtypeStruct((n_p, f_p), jnp.bfloat16)),
        grid=(n_row, n_col),
        in_specs=[
            pl.BlockSpec((tm, tk), lambda i, j: (i, j)),             # adj tile
            pl.BlockSpec((tk, f_p), lambda i, j: (j, 0)),            # y tile
            pl.BlockSpec((tm, 1), lambda i, j: (i, 0)),              # norm rows
            pl.BlockSpec((tm, f_p), lambda i, j: (i, 0)),            # acc in
            pl.BlockSpec((1,), lambda i, j: (0,),
                         memory_space=pltpu.MemorySpace.SMEM),       # coeff_i
        ],
        out_specs=(pl.BlockSpec((tm, f_p), lambda i, j: (i, 0)),     # acc out
                   pl.BlockSpec((tm, f_p), lambda i, j: (i, 0))),    # y next
        scratch_shapes=[pltpu.VMEM((tm, f_p), jnp.float32)],         # psum
        input_output_aliases={3: 0},                                 # acc in->out
        compiler_params=pltpu.CompilerParams(
            dimension_semantics=("parallel", "arbitrary"),
            vmem_limit_bytes=VMEM_LIMIT),
        cost_estimate=prop_cost,
    )

    for i in range(1, k + 1):
        acc, y = prop_call(adj_p, y, norm_p, acc, coeffs[i - 1:i])

    return acc[:n, :f_out]


def egconv_ref(adj, feat, norm, w, b, lam, k):
    """Plain-JAX reference mirroring the PyTorch forward loop exactly."""
    feat_list = [feat]
    cur = feat
    for _ in range(k):
        cur = norm * (adj @ (cur * norm))
        feat_list.append(cur)
    result = jnp.zeros((feat.shape[0], w.shape[1]), jnp.float32)
    for i, kf in enumerate(feat_list):
        result = result + (kf * (lam ** i / math.factorial(i))) @ w + b
    return result


if __name__ == "__main__":
    def _run_case(case_id, n, f_in, f_out, k, force_stream, tol):
        key = jax.random.fold_in(jax.random.PRNGKey(0), case_id)
        k_adj, k_feat, k_w, k_b, k_lam = jax.random.split(key, 5)

        # Synthetic directed graph: adj[v, u] = 1 iff edge u -> v.
        adj = jax.random.bernoulli(k_adj, 0.1, (n, n)).astype(jnp.float32)
        feat = jax.random.normal(k_feat, (n, f_in), jnp.float32)

        # in-degree of node v = row-sum of adj (clamped at 1), norm = deg^-0.5.
        degs = jnp.maximum(adj.sum(axis=1), 1.0)
        norm = (degs ** -0.5)[:, None]

        stdv = 1.0 / math.sqrt(f_out)
        w_pt = jax.random.uniform(k_w, (f_out, f_in), jnp.float32, -stdv, stdv)
        w = w_pt.T                                    # (F_in, F_out) for x @ w
        b = 0.1 * jax.random.normal(k_b, (1, f_out), jnp.float32)
        stdvk = 1.0 / math.sqrt(k)
        lam = jax.random.uniform(k_lam, (), jnp.float32, -stdvk, stdvk)

        out = egconv_forward(adj, feat, norm, w, b, lam, k, force_stream)
        out = jax.block_until_ready(out)
        ref = egconv_ref(adj, feat, norm, w, b, lam, k)
        assert out.shape == (n, f_out) and out.dtype == jnp.float32
        err = float(jnp.max(jnp.abs(out - ref)))
        assert jnp.allclose(out, ref, atol=tol, rtol=tol), (case_id, err)

    # Small graph -> fused single-launch path (graph fully VMEM-resident).
    _run_case(0, 64, 32, 32, 2, False, 2e-2)
    # Larger graph, forced streaming path -> real multi-tile grid, accumulator
    # carried across the k sequential calls via input_output_aliases.
    _run_case(1, 600, 40, 48, 3, True, 3e-2)

    print("KERNEL_OK")
</pallas_src>

<mosaic_0001>
module attributes {stable_mosaic.version = 11 : i64} {
  func.func @_fused_kernel(%arg0: i32, %arg1: memref<128x128xf32, #tpu.memory_space<vmem>>, %arg2: memref<128x128xf32, #tpu.memory_space<vmem>>, %arg3: memref<1x128xf32, #tpu.memory_space<vmem>>, %arg4: memref<128x128xbf16, #tpu.memory_space<vmem>>, %arg5: memref<128x1xf32, #tpu.memory_space<vmem>>, %arg6: memref<2xf32, #tpu.memory_space<smem>>, %arg7: memref<128x128xf32, #tpu.memory_space<vmem>>, %arg8: memref<128x128xbf16, #tpu.memory_space<vmem>>) attributes {dimension_semantics = [#tpu.dimension_semantics<arbitrary>], iteration_bounds = array<i64: 2>, scalar_prefetch = 0 : i64, scratch_operands = 1 : i64, tpu.core_type = #tpu.core_type<tc>, window_params = [{pipeline_mode = #tpu.pipeline_mode<synchronous>, transform_indices = @transform_0, window_bounds = array<i64: 128, 128>}, {pipeline_mode = #tpu.pipeline_mode<synchronous>, transform_indices = @transform_1, window_bounds = array<i64: 128, 128>}, {pipeline_mode = #tpu.pipeline_mode<synchronous>, transform_indices = @transform_2, window_bounds = array<i64: 1, 128>}, {pipeline_mode = #tpu.pipeline_mode<synchronous>, transform_indices = @transform_3, window_bounds = array<i64: 128, 128>}, {pipeline_mode = #tpu.pipeline_mode<synchronous>, transform_indices = @transform_4, window_bounds = array<i64: 128, 1>}, {transform_indices = @transform_5, window_bounds = array<i64: 2>}, {pipeline_mode = #tpu.pipeline_mode<synchronous>, transform_indices = @transform_6, window_bounds = array<i64: 128, 128>}]} {
    %c0_i32 = arith.constant 0 : i32
    %0 = arith.cmpi eq, %arg0, %c0_i32 : i32
    %1 = arith.extui %0 : i1 to i32
    %c0_i32_0 = arith.constant 0 : i32
    %2 = arith.cmpi ne, %1, %c0_i32_0 : i32
    scf.if %2 {
      %c0_12 = arith.constant 0 : index
      %c0_13 = arith.constant 0 : index
      %20 = vector.load %arg1[%c0_12, %c0_13] : memref<128x128xf32, #tpu.memory_space<vmem>>, vector<128x128xf32>
      %c0_14 = arith.constant 0 : index
      %c0_15 = arith.constant 0 : index
      %21 = vector.load %arg2[%c0_14, %c0_15] : memref<128x128xf32, #tpu.memory_space<vmem>>, vector<128x128xf32>
      %cst_16 = arith.constant dense<0.000000e+00> : vector<128x128xf32>
      %22 = tpu.matmul %20, %21, %cst_16 {dimension_numbers = #tpu.dot_dimension_numbers<[1], [0], [0], [1], [0, 0, 1, 1], [], []>} : vector<128x128xf32>, vector<128x128xf32>, vector<128x128xf32> -> vector<128x128xf32>
      %c0_17 = arith.constant 0 : index
      %c0_18 = arith.constant 0 : index
      %23 = vector.load %arg3[%c0_17, %c0_18] : memref<1x128xf32, #tpu.memory_space<vmem>>, vector<1x128xf32>
      %24 = vector.broadcast %23 : vector<1x128xf32> to vector<128x128xf32>
      %25 = arith.addf %22, %24 : vector<128x128xf32>
      %c0_19 = arith.constant 0 : index
      %c0_20 = arith.constant 0 : index
      %26 = vector.load %arg7[%c0_19, %c0_20] : memref<128x128xf32, #tpu.memory_space<vmem>>, vector<128x128xf32>
      tpu.vector_store %arg7[%c0_19, %c0_20], %25 {strides = array<i32>} : memref<128x128xf32, #tpu.memory_space<vmem>>, vector<128x128xf32>,
      %c0_21 = arith.constant 0 : index
      %c0_22 = arith.constant 0 : index
      %27 = vector.load %arg5[%c0_21, %c0_22] : memref<128x1xf32, #tpu.memory_space<vmem>>, vector<128x1xf32>
      %28 = vector.broadcast %27 : vector<128x1xf32> to vector<128x128xf32>
      %29 = arith.mulf %22, %28 : vector<128x128xf32>
      %30 = arith.truncf %29 : vector<128x128xf32> to vector<128x128xbf16>
      %c0_23 = arith.constant 0 : index
      %c0_24 = arith.constant 0 : index
      %31 = vector.load %arg8[%c0_23, %c0_24] : memref<128x128xbf16, #tpu.memory_space<vmem>>, vector<128x128xbf16>
      tpu.vector_store %arg8[%c0_23, %c0_24], %30 {strides = array<i32>} : memref<128x128xbf16, #tpu.memory_space<vmem>>, vector<128x128xbf16>,
    } else {
    }
    %c0 = arith.constant 0 : index
    %c0_1 = arith.constant 0 : index
    %3 = vector.load %arg5[%c0, %c0_1] : memref<128x1xf32, #tpu.memory_space<vmem>>, vector<128x1xf32>
    %c0_2 = arith.constant 0 : index
    %c0_3 = arith.constant 0 : index
    %4 = vector.load %arg4[%c0_2, %c0_3] : memref<128x128xbf16, #tpu.memory_space<vmem>>, vector<128x128xbf16>
    %c0_4 = arith.constant 0 : index
    %c0_5 = arith.constant 0 : index
    %5 = vector.load %arg8[%c0_4, %c0_5] : memref<128x128xbf16, #tpu.memory_space<vmem>>, vector<128x128xbf16>
    %cst = arith.constant dense<0.000000e+00> : vector<128x128xf32>
    %6 = tpu.matmul %4, %5, %cst {dimension_numbers = #tpu.dot_dimension_numbers<[1], [0], [0], [1], [0, 0, 1, 1], [], []>} : vector<128x128xbf16>, vector<128x128xbf16>, vector<128x128xf32> -> vector<128x128xf32>
    %7 = vector.broadcast %3 : vector<128x1xf32> to vector<128x128xf32>
    %8 = arith.mulf %7, %6 : vector<128x128xf32>
    %c0_6 = arith.constant 0 : index
    %c0_7 = arith.constant 0 : index
    %9 = vector.load %arg7[%c0_6, %c0_7] : memref<128x128xf32, #tpu.memory_space<vmem>>, vector<128x128xf32>
    %10 = arith.index_cast %arg0 : i32 to index
    %11 = memref.load %arg6[%10] : memref<2xf32, #tpu.memory_space<smem>>
    %12 = vector.broadcast %11 : f32 to vector<128x128xf32>
    %13 = arith.mulf %12, %8 : vector<128x128xf32>
    %14 = arith.addf %9, %13 : vector<128x128xf32>
    %c0_8 = arith.constant 0 : index
    %c0_9 = arith.constant 0 : index
    %15 = vector.load %arg7[%c0_8, %c0_9] : memref<128x128xf32, #tpu.memory_space<vmem>>, vector<128x128xf32>
    tpu.vector_store %arg7[%c0_8, %c0_9], %14 {strides = array<i32>} : memref<128x128xf32, #tpu.memory_space<vmem>>, vector<128x128xf32>,
    %16 = vector.broadcast %3 : vector<128x1xf32> to vector<128x128xf32>
    %17 = arith.mulf %8, %16 : vector<128x128xf32>
    %18 = arith.truncf %17 : vector<128x128xf32> to vector<128x128xbf16>
    %c0_10 = arith.constant 0 : index
    %c0_11 = arith.constant 0 : index
    %19 = vector.load %arg8[%c0_10, %c0_11] : memref<128x128xbf16, #tpu.memory_space<vmem>>, vector<128x128xbf16>
    tpu.vector_store %arg8[%c0_10, %c0_11], %18 {strides = array<i32>} : memref<128x128xbf16, #tpu.memory_space<vmem>>, vector<128x128xbf16>,
    return
  }
  func.func @transform_0(%arg0: i32) -> (i32, i32) {
    %c0_i32 = arith.constant 0 : i32
    %c0_i32_0 = arith.constant 0 : i32
    %c0_i32_1 = arith.constant 0 : i32
    return %c0_i32, %c0_i32_0 : i32, i32
  }
  func.func @transform_1(%arg0: i32) -> (i32, i32) {
    %c0_i32 = arith.constant 0 : i32
    %c0_i32_0 = arith.constant 0 : i32
    %c0_i32_1 = arith.constant 0 : i32
    return %c0_i32, %c0_i32_0 : i32, i32
  }
  func.func @transform_2(%arg0: i32) -> (i32, i32) {
    %c0_i32 = arith.constant 0 : i32
    %c0_i32_0 = arith.constant 0 : i32
    %c0_i32_1 = arith.constant 0 : i32
    return %c0_i32, %c0_i32_0 : i32, i32
  }
  func.func @transform_3(%arg0: i32) -> (i32, i32) {
    %c0_i32 = arith.constant 0 : i32
    %c0_i32_0 = arith.constant 0 : i32
    %c0_i32_1 = arith.constant 0 : i32
    return %c0_i32, %c0_i32_0 : i32, i32
  }
  func.func @transform_4(%arg0: i32) -> (i32, i32) {
    %c0_i32 = arith.constant 0 : i32
    %c0_i32_0 = arith.constant 0 : i32
    %c0_i32_1 = arith.constant 0 : i32
    return %c0_i32, %c0_i32_0 : i32, i32
  }
  func.func @transform_5(%arg0: i32) -> i32 {
    %c0_i32 = arith.constant 0 : i32
    %c0_i32_0 = arith.constant 0 : i32
    return %c0_i32 : i32
  }
  func.func @transform_6(%arg0: i32) -> (i32, i32) {
    %c0_i32 = arith.constant 0 : i32
    %c0_i32_0 = arith.constant 0 : i32
    %c0_i32_1 = arith.constant 0 : i32
    return %c0_i32, %c0_i32_0 : i32, i32
  }
}

</mosaic_0001>

<bundles_post_ra>
// kernel: egconv_forward.1
= control target key start
LH: loop header
LB: loop body
LE: loop exit
PB: predicated region body
PF: predicated region fallthrough
CT: control target
= control target key end

     0   :  { %11 = vsyncpa [#allocation4], 0  ;;  %s1644_s21 = smov 0   ;;  %s2112_s0 = inlined_call_operand.vmem [shape: f32[128,128], index: 0, kind: input, shape index: {}]   ;;  %s2113_s1 = inlined_call_operand.vmem [shape: f32[128,128], index: 1, kind: input, shape index: {}]   ;;  %s2114_s2 = inlined_call_operand.vmem [shape: f32[1,128], index: 2, kind: input, shape index: {}]   ;;  %s2115_s3 = inlined_call_operand.vmem [shape: bf16[128,128], index: 3, kind: input, shape index: {}]   ;;  %s2116_s4 = inlined_call_operand.vmem [shape: f32[128,1], index: 4, kind: input, shape index: {}]   ;;  %s2117_s5 = inlined_call_operand.vmem [shape: f32[2], index: 5, kind: input, shape index: {}]   ;;  %s2118_s6 = inlined_call_operand.vmem [shape: f32[128,128], index: 6, kind: output, shape index: {}]  }
   0x1 LB: > { %s1650_s22 = sadd.s32 4294967295, %s1604_s21   ;;  %p1172_p0 = scmp.ge.s32.totalorder %s1604_s21, 1  ;;  %s1604_s21 = sphi %s1644_s21, %s17_s21  }
   0x2   : > { %p169_p1 = scmp.lt.s32.totalorder %s1604_s21, 3  ;;  %s197_s25 = sshll.u32 %s2117_s5, 4  ;;  %s198_s25 = int_to_ptr.vmem [resolvable:$true] %s197_s25 }
   0x3   : > { %p1546_p4 = scmp.eq.s32.totalorder %s1650_s22, 0  ;;  %s1579_s27 = scalar_lea.vmem %s198_s25, 16 }
   0x4   : > { %p1658_p3 = pnand %p1172_p0, %p169_p1  ;;  %p1580_p7 = scmp.ne.s32.totalorder %s198_s25, %s1579_s27 }
   0x5   : > { %p1587_p11 = scmp.lt.s32.totalorder %s198_s25, %s198_s25  ;;  %p1588_p12 = scmp.lt.s32.totalorder %s1579_s27, %s1579_s27 }
   0x6   : > { %p1542_p5 = pneg %p1658_p3 }
   0x7   : > { %p1589_p13 = por %p1588_p12, %p1587_p11 }
   0x8   : > { %p1543_p6 = pnand %p1546_p4, %p1542_p5 }
   0xa   : > { %p1581_p8 = pneg %p1543_p6 }
   0xc   : > { %p1582_p9 = pnand %p1581_p8, %p1580_p7 }
   0xe   : > { %p1583_p10 = pneg %p1582_p9 }
  0x10   : > { %p1590_p2 = pnand %p1589_p13, %p1583_p10 }
  0x12   : > { %1593 = shalt.err (!%p1590_p2)
}
  0x13   : > { %s1606_s28 = smov [#allocation3]   ;;  %210 = sbr.rel (%p1658_p3) target bundleno = 539 (0x21b), region = 44 }
  0x14   : > { %1545 = dma.vmem_to_smem (!%p1543_p6), %s198_s25, 16, %s1606_s28, [#allocation4]  }
  0x18   : > { %1599 = dma.done.wait (%p1546_p4), [#allocation4], 16  }
  0x19   : > { %1601 = vsyncadd (%p1546_p4), [#allocation4], 4294967280 }
  0x1a   : > { %216 = sfence }
  0x1b   : > { %p2120_p0 = scmp.ne.s32.totalorder %s1650_s22, 0 }
  0x1d   : > { %235 = sbr.rel (%p2120_p0) target bundleno = 281 (0x119), region = 52 }
  0x22   : > { %v267_v0 = vld [vmem:[%s2113_s1 + $0x78] sm:$0xff]  ;;  %v266_v1 = vld [vmem:[%s2113_s1 + $0x70] sm:$0xff]  ;;  %v265_v2 = vld [vmem:[%s2113_s1 + $0x68] sm:$0xff]  ;;  %v1607_v28 = vmov 0  }
  0x23   : > { %1402 = vmatprep.subr.mxu0 %v267_v0  ;;  %1490 = vmatprep.subr.mxu1 %v267_v0  ;;  %v264_v3 = vld [vmem:[%s2113_s1 + $0x60] sm:$0xff]  ;;  %v263_v4 = vld [vmem:[%s2113_s1 + $0x58] sm:$0xff]  ;;  %v262_v5 = vld [vmem:[%s2113_s1 + $0x50] sm:$0xff] }
  0x24   : > { %1403 = vmatpush3.msra.mxu0 %v267_v0  ;;  %1506 = vmatpush3.msra.mxu1 %v267_v0  ;;  %v261_v6 = vld [vmem:[%s2113_s1 + $0x48] sm:$0xff]  ;;  %v260_v7 = vld [vmem:[%s2113_s1 + $0x40] sm:$0xff]  ;;  %v259_v8 = vld [vmem:[%s2113_s1 + $0x38] sm:$0xff] }
  0x25   : > { %1404 = vmatprep.subr.mxu0 %v266_v1  ;;  %1491 = vmatprep.subr.mxu1 %v266_v1  ;;  %v258_v9 = vld [vmem:[%s2113_s1 + $0x30] sm:$0xff]  ;;  %v257_v10 = vld [vmem:[%s2113_s1 + $0x28] sm:$0xff]  ;;  %v256_v11 = vld [vmem:[%s2113_s1 + $0x20] sm:$0xff] }
  0x26   : > { %1405 = vmatpush3.msra.mxu0 %v266_v1  ;;  %1507 = vmatpush3.msra.mxu1 %v266_v1  ;;  %v255_v12 = vld [vmem:[%s2113_s1 + $0x18] sm:$0xff]  ;;  %v254_v13 = vld [vmem:[%s2113_s1 + $0x10] sm:$0xff]  ;;  %v253_v14 = vld [vmem:[%s2113_s1 + $0x8] sm:$0xff] }
  0x27   : > { %1406 = vmatprep.subr.mxu0 %v265_v2  ;;  %1492 = vmatprep.subr.mxu1 %v265_v2  ;;  %v252_v15 = vld [vmem:[%s2113_s1] sm:$0xff]  ;;  %v237_v18 = vld [vmem:[%s2112_s0 + $0x8] sm:$0xff]  ;;  %v238_v20 = vld [vmem:[%s2112_s0 + $0x10] sm:$0xff] }
  0x28   : > { %1407 = vmatpush3.msra.mxu0 %v265_v2  ;;  %1508 = vmatpush3.msra.mxu1 %v265_v2  ;;  %v236_v16 = vld [vmem:[%s2112_s0] sm:$0xff]  ;;  %v245_v19 = vld [vmem:[%s2112_s0 + $0x48] sm:$0xff]  ;;  %v246_v21 = vld [vmem:[%s2112_s0 + $0x50] sm:$0xff] }
  0x29   : > { %1408 = vmatprep.subr.mxu0 %v264_v3  ;;  %1493 = vmatprep.subr.mxu1 %v264_v3  ;;  %v244_v17 = vld [vmem:[%s2112_s0 + $0x40] sm:$0xff]  ;;  %v454_v22 = vld [vmem:[%s2116_s4 + $0x10] sm:$0xff]  ;;  %v239_v24 = vld [vmem:[%s2112_s0 + $0x18] sm:$0xff] }
  0x2a   : > { %1409 = vmatpush3.msra.mxu0 %v264_v3  ;;  %1509 = vmatpush3.msra.mxu1 %v264_v3  ;;  %v452_v23 = vld [vmem:[%s2116_s4] sm:$0xff]  ;;  %v247_v25 = vld [vmem:[%s2112_s0 + $0x58] sm:$0xff]  ;;  %v453_v30 = vld [vmem:[%s2116_s4 + $0x8] sm:$0xff] }
  0x2b   : > { %1410 = vmatprep.subr.mxu0 %v263_v4  ;;  %1494 = vmatprep.subr.mxu1 %v263_v4  ;;  %v240_v26 = vld [vmem:[%s2112_s0 + $0x20] sm:$0xff]  ;;  %v455_v29 = vld [vmem:[%s2116_s4 + $0x18] sm:$0xff]  ;;  %v241_v31 = vld [vmem:[%s2112_s0 + $0x28] sm:$0xff] }
  0x2c   : > { %1411 = vmatpush3.msra.mxu0 %v263_v4  ;;  %1510 = vmatpush3.msra.mxu1 %v263_v4  ;;  %v248_v27 = vld [vmem:[%s2112_s0 + $0x60] sm:$0xff]  ;;  %v249_v32 = vld [vmem:[%s2112_s0 + $0x68] sm:$0xff]  ;;  %v242_v33 = vld [vmem:[%s2112_s0 + $0x30] sm:$0xff] }
  0x2d   : > { %1412 = vmatprep.subr.mxu0 %v262_v5  ;;  %1495 = vmatprep.subr.mxu1 %v262_v5  ;;  %v250_v34 = vld [vmem:[%s2112_s0 + $0x70] sm:$0xff]  ;;  %v457_v35 = vld [vmem:[%s2116_s4 + $0x28] sm:$0xff]  ;;  %v456_v36 = vld [vmem:[%s2116_s4 + $0x20] sm:$0xff] }
  0x2e   : > { %1413 = vmatpush3.msra.mxu0 %v262_v5  ;;  %1511 = vmatpush3.msra.mxu1 %v262_v5  ;;  %v243_v37 = vld [vmem:[%s2112_s0 + $0x38] sm:$0xff]  ;;  %v458_v40 = vld [vmem:[%s2116_s4 + $0x30] sm:$0xff]  ;;  %v461_v41 = vld [vmem:[%s2116_s4 + $0x48] sm:$0xff] }
  0x2f   : > { %1414 = vmatprep.subr.mxu0 %v261_v6  ;;  %1496 = vmatprep.subr.mxu1 %v261_v6  ;;  %v251_v38 = vld [vmem:[%s2112_s0 + $0x78] sm:$0xff]  ;;  %v460_v42 = vld [vmem:[%s2116_s4 + $0x40] sm:$0xff]  ;;  %v462_v44 = vld [vmem:[%s2116_s4 + $0x50] sm:$0xff] }
  0x30   : > { %1415 = vmatpush3.msra.mxu0 %v261_v6  ;;  %1512 = vmatpush3.msra.mxu1 %v261_v6  ;;  %v459_v39 = vld [vmem:[%s2116_s4 + $0x38] sm:$0xff]  ;;  %v465_v45 = vld [vmem:[%s2116_s4 + $0x68] sm:$0xff]  ;;  %v464_v46 = vld [vmem:[%s2116_s4 + $0x60] sm:$0xff] }
  0x31   : > { %1416 = vmatprep.subr.mxu0 %v260_v7  ;;  %1497 = vmatprep.subr.mxu1 %v260_v7  ;;  %v463_v43 = vld [vmem:[%s2116_s4 + $0x58] sm:$0xff]  ;;  %v466_v48 = vld [vmem:[%s2116_s4 + $0x70] sm:$0xff]  ;;  %v1826_v59 = vld [vmem:[%s2114_s2] ss:$0 sm:$0xff] }
  0x32   : > { %1417 = vmatpush3.msra.mxu0 %v260_v7  ;;  %1513 = vmatpush3.msra.mxu1 %v260_v7  ;;  %v467_v47 = vld [vmem:[%s2116_s4 + $0x78] sm:$0xff] }
  0x33   : > { %1418 = vmatprep.subr.mxu0 %v259_v8  ;;  %1498 = vmatprep.subr.mxu1 %v259_v8 }
  0x34   : > { %1419 = vmatpush3.msra.mxu0 %v259_v8  ;;  %1514 = vmatpush3.msra.mxu1 %v259_v8 }
  0x35   : > { %1420 = vmatprep.subr.mxu0 %v258_v9  ;;  %1499 = vmatprep.subr.mxu1 %v258_v9 }
  0x36   : > { %1421 = vmatpush3.msra.mxu0 %v258_v9  ;;  %1515 = vmatpush3.msra.mxu1 %v258_v9 }
  0x37   : > { %1422 = vmatprep.subr.mxu0 %v257_v10  ;;  %1500 = vmatprep.subr.mxu1 %v257_v10 }
  0x38   : > { %1423 = vmatpush3.msra.mxu0 %v257_v10  ;;  %1516 = vmatpush3.msra.mxu1 %v257_v10 }
  0x39   : > { %1424 = vmatprep.subr.mxu0 %v256_v11  ;;  %1501 = vmatprep.subr.mxu1 %v256_v11 }
  0x3a   : > { %1425 = vmatpush3.msra.mxu0 %v256_v11  ;;  %1517 = vmatpush3.msra.mxu1 %v256_v11 }
  0x3b   : > { %1426 = vmatprep.subr.mxu0 %v255_v12  ;;  %1502 = vmatprep.subr.mxu1 %v255_v12 }
  0x3c   : > { %1427 = vmatpush3.msra.mxu0 %v255_v12  ;;  %1518 = vmatpush3.msra.mxu1 %v255_v12 }
  0x3d   : > { %1428 = vmatprep.subr.mxu0 %v254_v13  ;;  %1503 = vmatprep.subr.mxu1 %v254_v13 }
  0x3e   : > { %1429 = vmatpush3.msra.mxu0 %v254_v13  ;;  %1519 = vmatpush3.msra.mxu1 %v254_v13 }
  0x3f   : > { %1430 = vmatprep.subr.mxu0 %v253_v14  ;;  %1504 = vmatprep.subr.mxu1 %v253_v14 }
  0x40   : > { %1431 = vmatpush3.msra.mxu0 %v253_v14  ;;  %1520 = vmatpush3.msra.mxu1 %v253_v14 }
  0x41   : > { %1432 = vmatprep.subr.mxu0 %v252_v15  ;;  %1505 = vmatprep.subr.mxu1 %v252_v15 }
  0x42   : > { %1433 = vmatpush3.msra.mxu0 %v252_v15  ;;  %1521 = vmatpush3.msra.mxu1 %v252_v15 }
  0x43   : > { %1434 = vmatprep.mubr.f32.mxu0 %v236_v16  ;;  %1446 = vmatprep.mubr.f32.mxu1 %v244_v17 }
  0x44   : > { %1435 = vmatmul.mubr.f32.vlgmr.msra.gmra.mxu0 %v237_v18  ;;  %1447 = vmatmul.mubr.f32.vlgmr.msra.gmra.mxu1 %v245_v19 }
  0x45   : > { %1437 = vmatprep.mubr.f32.mxu0 %v238_v20  ;;  %1449 = vmatprep.mubr.f32.mxu1 %v246_v21 }
  0x46   : > { %1560 = vset.pattern.permute.xlu1 %v1607_v28  ;;  %1559 = vset.pattern.permute.xlu0 %v1607_v28 }
  0x47   : > { %480 = vperm.xlu1 %1560, %v454_v22   ;;  %470 = vperm.xlu0 %1559, %v452_v23  }
  0x48   : > { %1438 = vmatmul.mubr.f32.gmra.mxu0 %v239_v24  ;;  %1450 = vmatmul.mubr.f32.gmra.mxu1 %v247_v25 }
  0x49   : > { %1440 = vmatprep.mubr.f32.mxu0 %v240_v26  ;;  %1452 = vmatprep.mubr.f32.mxu1 %v248_v27 }
  0x4b   : > { %485 = vperm.xlu1 %1560, %v455_v29   ;;  %475 = vperm.xlu0 %1559, %v453_v30  }
  0x4c   : > { %1441 = vmatmul.mubr.f32.gmra.mxu0 %v241_v31  ;;  %1453 = vmatmul.mubr.f32.gmra.mxu1 %v249_v32 }
  0x4d   : > { %1443 = vmatprep.mubr.f32.mxu0 %v242_v33  ;;  %1455 = vmatprep.mubr.f32.mxu1 %v250_v34 }
  0x4f   : > { %495 = vperm.xlu1 %1560, %v457_v35   ;;  %490 = vperm.xlu0 %1559, %v456_v36  }
  0x50   : > { %1444 = vmatmul.mubr.f32.gmra.mxu0 %v243_v37  ;;  %1456 = vmatmul.mubr.f32.gmra.mxu1 %v251_v38 }
  0x53   : > { %505 = vperm.xlu1 %1560, %v459_v39   ;;  %500 = vperm.xlu0 %1559, %v458_v40  }
  0x57   : > { %515 = vperm.xlu1 %1560, %v461_v41   ;;  %510 = vperm.xlu0 %1559, %v460_v42  }
  0x5b   : > { %525 = vperm.xlu1 %1560, %v463_v43   ;;  %520 = vperm.xlu0 %1559, %v462_v44  }
  0x5f   : > { %535 = vperm.xlu1 %1560, %v465_v45   ;;  %530 = vperm.xlu0 %1559, %v464_v46  }
  0x63   : > { %545 = vperm.xlu1 %1560, %v467_v47   ;;  %540 = vperm.xlu0 %1559, %v466_v48  }
  0xc2   : > { %v481_v49 = vpop.permute.xlu1 %480  ;;  %v471_v50 = vpop.permute.xlu0 %470 }
  0xc6   : > { %v486_v51 = vpop.permute.xlu1 %485  ;;  %v476_v52 = vpop.permute.xlu0 %475 }
  0xca   : > { %v496_v53 = vpop.permute.xlu1 %495  ;;  %v491_v54 = vpop.permute.xlu0 %490 }
  0xce   : > { %v1819_v55 = vpop.permute.xlu1 %505  ;;  %v1821_v56 = vpop.permute.xlu0 %500 }
  0xd2   : > { %v516_v57 = vpop.permute.xlu1 %515  ;;  %v511_v58 = vpop.permute.xlu0 %510 }
  0xd6   : > { %v526_v62 = vpop.permute.xlu1 %525  ;;  %v521_v63 = vpop.permute.xlu0 %520 }
  0xda   : > { %v536_v20 = vpop.permute.xlu1 %535  ;;  %v531_v21 = vpop.permute.xlu0 %530 }
  0xde   : > { %v546_v42 = vpop.permute.xlu1 %545  ;;  %v541_v43 = vpop.permute.xlu0 %540 }
 0x104   : > { %v1436_v60 = vpop.f32.mrf.mxu0  ;;  %v1448_v61 = vpop.f32.mrf.mxu1 }
 0x105   : > { %v421_v0 = vadd.f32 %v1436_v60, %v1826_v59  ;;  %v429_v1 = vadd.f32 %v1448_v61, %v1826_v59  ;;  %v549_v2 = vmul.f32 %v1436_v60, %v476_v52  ;;  %v557_v3 = vmul.f32 %v1448_v61, %v516_v57 }
 0x106   : > { %v334_v4 = vpop.f32.mrf.mxu0  ;;  %v374_v5 = vpop.f32.mrf.mxu1 }
 0x107   : > { %437 = vst [vmem:[%s2118_s6 + $0x8] sm:$0xff] %v421_v0  ;;  %445 = vst [vmem:[%s2118_s6 + $0x48] sm:$0xff] %v429_v1  ;;  %v420_v6 = vadd.f32 %v1826_v59, %v334_v4  ;;  %v548_v7 = vmul.f32 %v471_v50, %v334_v4  ;;  %v428_v8 = vadd.f32 %v1826_v59, %v374_v5 }
 0x108   : > { %v556_v9 = vmul.f32 %v511_v58, %v374_v5  ;;  %v1439_v10 = vpop.f32.mrf.mxu0  ;;  %v1451_v11 = vpop.f32.mrf.mxu1 }
 0x109   : > { %436 = vst [vmem:[%s2118_s6] sm:$0xff] %v420_v6  ;;  %v1263_v12 = vpack.c.bf16 %v549_v2, %v548_v7  ;;  %444 = vst [vmem:[%s2118_s6 + $0x40] sm:$0xff] %v428_v8  ;;  %v423_v14 = vadd.f32 %v1439_v10, %v1826_v59  ;;  %v551_v15 = vmul.f32 %v1439_v10, %v486_v51 }
 0x10a   : > { %v1283_v13 = vpack.c.bf16 %v557_v3, %v556_v9  ;;  %v431_v16 = vadd.f32 %v1451_v11, %v1826_v59  ;;  %v559_v17 = vmul.f32 %v1451_v11, %v526_v62  ;;  %v344_v18 = vpop.f32.mrf.mxu0  ;;  %v384_v19 = vpop.f32.mrf.mxu1 }
 0x10b   : > { %1264 = vst [vmem:[#allocation2] sm:$0xff] %v1263_v12   ;;  %439 = vst [vmem:[%s2118_s6 + $0x18] sm:$0xff] %v423_v14  ;;  %v422_v22 = vadd.f32 %v1826_v59, %v344_v18  ;;  %v550_v23 = vmul.f32 %v481_v49, %v344_v18  ;;  %v430_v24 = vadd.f32 %v1826_v59, %v384_v19 }
 0x10c   : > { %1343 = vst [vmem:[#allocation2 + $0x20] sm:$0xff] %v1283_v13   ;;  %v558_v25 = vmul.f32 %v521_v63, %v384_v19  ;;  %447 = vst [vmem:[%s2118_s6 + $0x58] sm:$0xff] %v431_v16  ;;  %v1442_v26 = vpop.f32.mrf.mxu0  ;;  %v1454_v27 = vpop.f32.mrf.mxu1 }
 0x10d   : > { %438 = vst [vmem:[%s2118_s6 + $0x10] sm:$0xff] %v422_v22  ;;  %v1268_v28 = vpack.c.bf16 %v551_v15, %v550_v23  ;;  %446 = vst [vmem:[%s2118_s6 + $0x50] sm:$0xff] %v430_v24  ;;  %v425_v30 = vadd.f32 %v1442_v26, %v1826_v59  ;;  %v553_v31 = vmul.f32 %v1442_v26, %v496_v53 }
 0x10e   : > { %v1288_v29 = vpack.c.bf16 %v559_v17, %v558_v25  ;;  %v433_v32 = vadd.f32 %v1454_v27, %v1826_v59  ;;  %v561_v33 = vmul.f32 %v1454_v27, %v536_v20  ;;  %v354_v34 = vpop.f32.mrf.mxu0  ;;  %v394_v35 = vpop.f32.mrf.mxu1 }
 0x10f   : > { %1340 = vst [vmem:[#allocation2 + $0x8] sm:$0xff] %v1268_v28   ;;  %441 = vst [vmem:[%s2118_s6 + $0x28] sm:$0xff] %v425_v30  ;;  %v424_v36 = vadd.f32 %v1826_v59, %v354_v34  ;;  %v552_v37 = vmul.f32 %v491_v54, %v354_v34  ;;  %v432_v38 = vadd.f32 %v1826_v59, %v394_v35 }
 0x110   : > { %1344 = vst [vmem:[#allocation2 + $0x28] sm:$0xff] %v1288_v29   ;;  %v560_v39 = vmul.f32 %v531_v21, %v394_v35  ;;  %449 = vst [vmem:[%s2118_s6 + $0x68] sm:$0xff] %v433_v32  ;;  %v1445_v40 = vpop.f32.mrf.mxu0  ;;  %v1457_v41 = vpop.f32.mrf.mxu1 }
 0x111   : > { %440 = vst [vmem:[%s2118_s6 + $0x20] sm:$0xff] %v424_v36  ;;  %v1273_v44 = vpack.c.bf16 %v553_v31, %v552_v37  ;;  %448 = vst [vmem:[%s2118_s6 + $0x60] sm:$0xff] %v432_v38  ;;  %v427_v46 = vadd.f32 %v1445_v40, %v1826_v59  ;;  %v555_v47 = vmul.f32 %v1445_v40, %v1819_v55 }
 0x112   : > { %v1293_v45 = vpack.c.bf16 %v561_v33, %v560_v39  ;;  %v435_v48 = vadd.f32 %v1457_v41, %v1826_v59  ;;  %v563_v49 = vmul.f32 %v1457_v41, %v546_v42  ;;  %v364_v50 = vpop.f32.mrf.mxu0  ;;  %v404_v51 = vpop.f32.mrf.mxu1 }
 0x113   : > { %1341 = vst [vmem:[#allocation2 + $0x10] sm:$0xff] %v1273_v44   ;;  %443 = vst [vmem:[%s2118_s6 + $0x38] sm:$0xff] %v427_v46  ;;  %v426_v52 = vadd.f32 %v1826_v59, %v364_v50  ;;  %v554_v53 = vmul.f32 %v1821_v56, %v364_v50  ;;  %v434_v54 = vadd.f32 %v1826_v59, %v404_v51 }
 0x114   : > { %1345 = vst [vmem:[#allocation2 + $0x30] sm:$0xff] %v1293_v45   ;;  %v562_v57 = vmul.f32 %v541_v43, %v404_v51  ;;  %451 = vst [vmem:[%s2118_s6 + $0x78] sm:$0xff] %v435_v48 }
 0x115   : > { %442 = vst [vmem:[%s2118_s6 + $0x30] sm:$0xff] %v426_v52  ;;  %v1278_v55 = vpack.c.bf16 %v555_v47, %v554_v53  ;;  %450 = vst [vmem:[%s2118_s6 + $0x70] sm:$0xff] %v434_v54 }
 0x116   : > { %v1298_v58 = vpack.c.bf16 %v563_v49, %v562_v57 }
 0x117   : > { %1342 = vst [vmem:[#allocation2 + $0x18] sm:$0xff] %v1278_v55  }
 0x118   : > { %1346 = vst [vmem:[#allocation2 + $0x38] sm:$0xff] %v1298_v58  }
 0x119 PF: > { %v1608_v60 = vmov 0   ;;  %v1565_v61 = vld [vmem:[#allocation2 + $0x28] sm:$0xff]   ;;  %v1566_v62 = vld [vmem:[#allocation2 + $0x20] sm:$0xff]   ;;  %v646_v3 = vld [vmem:[%s2116_s4 + $0x10] sm:$0xff]  ;;  %s997_s7 = sld [smem:[#allocation3 + %s1650_s22]] }
 0x11a   : > { %1562 = vset.pattern.permute.xlu1 %v1608_v60  ;;  %1561 = vset.pattern.permute.xlu0 %v1608_v60  ;;  %v1571_v63 = vld [vmem:[%s2115_s3] sm:$0xff]   ;;  %v1568_v2 = vld [vmem:[#allocation2 + $0x10] sm:$0xff]   ;;  %v647_v5 = vld [vmem:[%s2116_s4 + $0x18] sm:$0xff] }
 0x11b   : > { %v1564_v59 = vld [vmem:[#allocation2 + $0x30] sm:$0xff]   ;;  %v1572_v0 = vld [vmem:[%s2115_s3 + $0x20] sm:$0xff]   ;;  %1474 = vmatprep.mubr.bf16.mxu0 %v1571_v63  ;;  %897 = vperm.xlu1 %1562, %v646_v3   ;;  %v645_v6 = vld [vmem:[%s2116_s4 + $0x8] sm:$0xff] }
 0x11c   : > { %1482 = vmatprep.mubr.bf16.mxu1 %v1572_v0  ;;  %v644_v4 = vld [vmem:[%s2116_s4] sm:$0xff]  ;;  %v1569_v7 = vld [vmem:[#allocation2 + $0x8] sm:$0xff]   ;;  %v651_v11 = vld [vmem:[%s2116_s4 + $0x38] sm:$0xff] }
 0x11d   : > { %887 = vperm.xlu0 %1561, %v644_v4   ;;  %v649_v8 = vld [vmem:[%s2116_s4 + $0x28] sm:$0xff]  ;;  %v648_v9 = vld [vmem:[%s2116_s4 + $0x20] sm:$0xff]  ;;  %v650_v12 = vld [vmem:[%s2116_s4 + $0x30] sm:$0xff] }
 0x11e   : > { %v1567_v1 = vld [vmem:[#allocation2 + $0x18] sm:$0xff]   ;;  %v1570_v10 = vld [vmem:[#allocation2] sm:$0xff]   ;;  %v1573_v13 = vld [vmem:[%s2115_s3 + $0x8] sm:$0xff]  }
 0x11f   : > { %v1563_v56 = vld [vmem:[#allocation2 + $0x38] sm:$0xff]   ;;  %902 = vperm.xlu1 %1562, %v647_v5   ;;  %v1574_v14 = vld [vmem:[%s2115_s3 + $0x28] sm:$0xff]   ;;  %v652_v16 = vld [vmem:[%s2116_s4 + $0x40] sm:$0xff]  ;;  %v1977_v39 = vstv %s997_s7 }
 0x120   : > { %1458 = vmatprep.subr.bf16.mxu0 %v1563_v56  ;;  %1522 = vmatprep.subr.bf16.mxu1 %v1563_v56  ;;  %v653_v15 = vld [vmem:[%s2116_s4 + $0x48] sm:$0xff]  ;;  %v1575_v17 = vld [vmem:[%s2115_s3 + $0x10] sm:$0xff]   ;;  %v655_v19 = vld [vmem:[%s2116_s4 + $0x58] sm:$0xff] }
 0x121   : > { %1459 = vmatpush3.bf16.msra.mxu0 %v1563_v56  ;;  %1530 = vmatpush3.bf16.msra.mxu1 %v1563_v56  ;;  %v1576_v18 = vld [vmem:[%s2115_s3 + $0x30] sm:$0xff]   ;;  %v1577_v21 = vld [vmem:[%s2115_s3 + $0x18] sm:$0xff]   ;;  %v657_v23 = vld [vmem:[%s2116_s4 + $0x68] sm:$0xff] }
 0x122   : > { %1460 = vmatprep.subr.bf16.mxu0 %v1564_v59  ;;  %1523 = vmatprep.subr.bf16.mxu1 %v1564_v59  ;;  %v654_v20 = vld [vmem:[%s2116_s4 + $0x50] sm:$0xff]  ;;  %v1578_v22 = vld [vmem:[%s2115_s3 + $0x38] sm:$0xff]   ;;  %v656_v24 = vld [vmem:[%s2116_s4 + $0x60] sm:$0xff] }
 0x123   : > { %892 = vperm.xlu0 %1561, %v645_v6   ;;  %912 = vperm.xlu1 %1562, %v649_v8   ;;  %v659_v25 = vld [vmem:[%s2116_s4 + $0x78] sm:$0xff]  ;;  %v658_v26 = vld [vmem:[%s2116_s4 + $0x70] sm:$0xff]  ;;  %v989_v60 = vld [vmem:[%s2118_s6 + $0x40] sm:$0xff] }
 0x124   : > { %v983_v44 = vld [vmem:[%s2118_s6 + $0x10] sm:$0xff]  ;;  %v984_v3 = vld [vmem:[%s2118_s6 + $0x18] sm:$0xff] }
 0x125   : > { %1461 = vmatpush3.bf16.msra.mxu0 %v1564_v59  ;;  %1531 = vmatpush3.bf16.msra.mxu1 %v1564_v59  ;;  %v991_v45 = vld [vmem:[%s2118_s6 + $0x50] sm:$0xff]  ;;  %v981_v59 = vld [vmem:[%s2118_s6] sm:$0xff]  ;;  %v992_v4 = vld [vmem:[%s2118_s6 + $0x58] sm:$0xff] }
 0x126   : > { %1462 = vmatprep.subr.bf16.mxu0 %v1565_v61  ;;  %1524 = vmatprep.subr.bf16.mxu1 %v1565_v61 }
 0x127   : > { %907 = vperm.xlu0 %1561, %v648_v9   ;;  %922 = vperm.xlu1 %1562, %v651_v11  }
 0x129   : > { %1463 = vmatpush3.bf16.msra.mxu0 %v1565_v61  ;;  %1532 = vmatpush3.bf16.msra.mxu1 %v1565_v61 }
 0x12a   : > { %1464 = vmatprep.subr.bf16.mxu0 %v1566_v62  ;;  %1525 = vmatprep.subr.bf16.mxu1 %v1566_v62 }
 0x12b   : > { %917 = vperm.xlu0 %1561, %v650_v12   ;;  %932 = vperm.xlu1 %1562, %v653_v15  }
 0x12d   : > { %1465 = vmatpush3.bf16.msra.mxu0 %v1566_v62  ;;  %1533 = vmatpush3.bf16.msra.mxu1 %v1566_v62 }
 0x12e   : > { %1466 = vmatprep.subr.bf16.mxu0 %v1567_v1  ;;  %1526 = vmatprep.subr.bf16.mxu1 %v1567_v1 }
 0x12f   : > { %927 = vperm.xlu0 %1561, %v652_v16   ;;  %942 = vperm.xlu1 %1562, %v655_v19  }
 0x131   : > { %1467 = vmatpush3.bf16.msra.mxu0 %v1567_v1  ;;  %1534 = vmatpush3.bf16.msra.mxu1 %v1567_v1 }
 0x132   : > { %1468 = vmatprep.subr.bf16.mxu0 %v1568_v2  ;;  %1527 = vmatprep.subr.bf16.mxu1 %v1568_v2 }
 0x133   : > { %937 = vperm.xlu0 %1561, %v654_v20   ;;  %952 = vperm.xlu1 %1562, %v657_v23   ;;  %v982_v23 = vld [vmem:[%s2118_s6 + $0x8] sm:$0xff] }
 0x135   : > { %1469 = vmatpush3.bf16.msra.mxu0 %v1568_v2  ;;  %1535 = vmatpush3.bf16.msra.mxu1 %v1568_v2 }
 0x136   : > { %1470 = vmatprep.subr.bf16.mxu0 %v1569_v7  ;;  %1528 = vmatprep.subr.bf16.mxu1 %v1569_v7 }
 0x137   : > { %947 = vperm.xlu0 %1561, %v656_v24   ;;  %962 = vperm.xlu1 %1562, %v659_v25   ;;  %v990_v24 = vld [vmem:[%s2118_s6 + $0x48] sm:$0xff] }
 0x139   : > { %1471 = vmatpush3.bf16.msra.mxu0 %v1569_v7  ;;  %1536 = vmatpush3.bf16.msra.mxu1 %v1569_v7 }
 0x13a   : > { %1472 = vmatprep.subr.bf16.mxu0 %v1570_v10  ;;  %1529 = vmatprep.subr.bf16.mxu1 %v1570_v10 }
 0x13b   : > { %957 = vperm.xlu0 %1561, %v658_v26  }
 0x13d   : > { %1473 = vmatpush3.bf16.msra.mxu0 %v1570_v10  ;;  %1537 = vmatpush3.bf16.msra.mxu1 %v1570_v10 }
 0x140   : > { %1475 = vmatmul.mubr.bf16.vlgmr.msra.gmra.mxu0 %v1573_v13  ;;  %1483 = vmatmul.mubr.bf16.vlgmr.msra.gmra.mxu1 %v1574_v14 }
 0x141   : > { %1478 = vmatprep.mubr.bf16.mxu0 %v1575_v17  ;;  %1486 = vmatprep.mubr.bf16.mxu1 %v1576_v18 }
 0x148   : > { %1479 = vmatmul.mubr.bf16.gmra.mxu0 %v1577_v21  ;;  %1487 = vmatmul.mubr.bf16.gmra.mxu1 %v1578_v22 }
 0x196   : > { %v898_v28 = vpop.permute.xlu1 %897 }
 0x198   : > { %v888_v27 = vpop.permute.xlu0 %887 }
 0x19a   : > { %v903_v30 = vpop.permute.xlu1 %902 }
 0x19e   : > { %v1966_v29 = vpop.permute.xlu0 %892  ;;  %v1970_v32 = vpop.permute.xlu1 %912 }
 0x1a2   : > { %v1968_v31 = vpop.permute.xlu0 %907  ;;  %v1974_v34 = vpop.permute.xlu1 %922 }
 0x1a6   : > { %v1972_v33 = vpop.permute.xlu0 %917  ;;  %v933_v36 = vpop.permute.xlu1 %932 }
 0x1aa   : > { %v928_v35 = vpop.permute.xlu0 %927  ;;  %v943_v41 = vpop.permute.xlu1 %942 }
 0x1ae   : > { %v938_v37 = vpop.permute.xlu0 %937  ;;  %v2003_v7 = vpop.permute.xlu1 %952 }
 0x1b2   : > { %v1985_v48 = vpop.permute.xlu0 %947 }
 0x1b6   : > { %v958_v18 = vpop.permute.xlu0 %957 }
 0x200   : > { %v1476_v38 = vpop.f32.mrf.mxu0  ;;  %v1484_v40 = vpop.f32.mrf.mxu1 }
 0x201   : > { %v967_v42 = vmul.f32 %v1476_v38, %v898_v28  ;;  %v975_v43 = vmul.f32 %v1484_v40, %v938_v37 }
 0x202   : > { %v822_v46 = vpop.f32.mrf.mxu0  ;;  %v854_v47 = vpop.f32.mrf.mxu1 }
 0x203   : > { %v1001_v49 = vmul.f32 %v1977_v39, %v967_v42  ;;  %v1009_v50 = vmul.f32 %v1977_v39, %v975_v43  ;;  %v1049_v51 = vmul.f32 %v967_v42, %v898_v28  ;;  %v1057_v52 = vmul.f32 %v975_v43, %v938_v37 }
 0x204   : > { %v965_v53 = vmul.f32 %v888_v27, %v822_v46  ;;  %v973_v54 = vmul.f32 %v928_v35, %v854_v47  ;;  %v1477_v57 = vpop.f32.mrf.mxu0  ;;  %v1485_v55 = vpop.f32.mrf.mxu1 }
 0x205   : > { %v1017_v58 = vadd.f32 %v1001_v49, %v983_v44  ;;  %v1025_v56 = vadd.f32 %v1009_v50, %v991_v45  ;;  %v968_v61 = vmul.f32 %v1477_v57, %v903_v30  ;;  %v976_v62 = vmul.f32 %v1485_v55, %v943_v41  ;;  %v987_v44 = vld [vmem:[%s2118_s6 + $0x30] sm:$0xff]  ;;  %v963_v49 = vpop.permute.xlu1 %962  ;;  %v993_v57 = vld [vmem:[%s2118_s6 + $0x60] sm:$0xff] }
 0x206   : > { %v999_v63 = vmul.f32 %v1977_v39, %v965_v53  ;;  %v1047_v0 = vmul.f32 %v965_v53, %v888_v27  ;;  %v1007_v1 = vmul.f32 %v1977_v39, %v973_v54  ;;  %v1055_v2 = vmul.f32 %v973_v54, %v928_v35  ;;  %v825_v5 = vpop.f32.mrf.mxu0  ;;  %v857_v6 = vpop.f32.mrf.mxu1  ;;  %v995_v45 = vld [vmem:[%s2118_s6 + $0x70] sm:$0xff]  ;;  %v985_v54 = vld [vmem:[%s2118_s6 + $0x20] sm:$0xff] }
 0x207   : > { %1033 = vst [vmem:[%s2118_s6 + $0x10] sm:$0xff] %v1017_v58  ;;  %1041 = vst [vmem:[%s2118_s6 + $0x50] sm:$0xff] %v1025_v56  ;;  %v1002_v8 = vmul.f32 %v1977_v39, %v968_v61  ;;  %v1050_v9 = vmul.f32 %v968_v61, %v903_v30  ;;  %v1010_v10 = vmul.f32 %v1977_v39, %v976_v62 }
 0x208   : > { %v1058_v11 = vmul.f32 %v976_v62, %v943_v41  ;;  %v1015_v12 = vadd.f32 %v999_v63, %v981_v59  ;;  %v1023_v13 = vadd.f32 %v1007_v1, %v989_v60  ;;  %v966_v14 = vmul.f32 %v1966_v29, %v825_v5  ;;  %v1480_v16 = vpop.f32.mrf.mxu0  ;;  %v1488_v17 = vpop.f32.mrf.mxu1 }
 0x209   : > { %v974_v15 = vmul.f32 %v933_v36, %v857_v6  ;;  %v1018_v19 = vadd.f32 %v1002_v8, %v984_v3  ;;  %v1308_v20 = vpack.c.bf16 %v1050_v9, %v1049_v51  ;;  %v1026_v21 = vadd.f32 %v1010_v10, %v992_v4  ;;  %v988_v3 = vld [vmem:[%s2118_s6 + $0x38] sm:$0xff]  ;;  %v986_v10 = vld [vmem:[%s2118_s6 + $0x28] sm:$0xff] }
 0x20a   : > { %v1328_v22 = vpack.c.bf16 %v1058_v11, %v1057_v52  ;;  %1031 = vst [vmem:[%s2118_s6] sm:$0xff] %v1015_v12  ;;  %1039 = vst [vmem:[%s2118_s6 + $0x40] sm:$0xff] %v1023_v13  ;;  %v1000_v25 = vmul.f32 %v1977_v39, %v966_v14  ;;  %v1048_v26 = vmul.f32 %v966_v14, %v1966_v29  ;;  %v838_v30 = vpop.f32.mrf.mxu0  ;;  %v870_v35 = vpop.f32.mrf.mxu1  ;;  %v994_v11 = vld [vmem:[%s2118_s6 + $0x68] sm:$0xff] }
 0x20b   : > { %v1008_v27 = vmul.f32 %v1977_v39, %v974_v15  ;;  %v1056_v28 = vmul.f32 %v974_v15, %v933_v36  ;;  %1034 = vst [vmem:[%s2118_s6 + $0x18] sm:$0xff] %v1018_v19  ;;  %1347 = vst [vmem:[#allocation2 + $0x8] sm:$0xff] %v1308_v20   ;;  %v971_v37 = vmul.f32 %v1480_v16, %v1972_v33 }
 0x20c   : > { %1042 = vst [vmem:[%s2118_s6 + $0x58] sm:$0xff] %v1026_v21  ;;  %1351 = vst [vmem:[#allocation2 + $0x28] sm:$0xff] %v1328_v22   ;;  %v979_v38 = vmul.f32 %v1488_v17, %v958_v18  ;;  %v969_v29 = vmul.f32 %v1968_v31, %v838_v30  ;;  %v977_v40 = vmul.f32 %v1985_v48, %v870_v35  ;;  %v1481_v46 = vpop.f32.mrf.mxu0  ;;  %v1489_v47 = vpop.f32.mrf.mxu1 }
 0x20d   : > { %v1016_v36 = vadd.f32 %v1000_v25, %v982_v23  ;;  %v1303_v41 = vpack.c.bf16 %v1048_v26, %v1047_v0  ;;  %v1024_v42 = vadd.f32 %v1008_v27, %v990_v24  ;;  %v1323_v43 = vpack.c.bf16 %v1056_v28, %v1055_v2 }
 0x20e   : > { %v1005_v50 = vmul.f32 %v1977_v39, %v971_v37  ;;  %v1053_v51 = vmul.f32 %v971_v37, %v1972_v33  ;;  %v1013_v52 = vmul.f32 %v1977_v39, %v979_v38  ;;  %v1061_v53 = vmul.f32 %v979_v38, %v958_v18  ;;  %v841_v59 = vpop.f32.mrf.mxu0  ;;  %v873_v60 = vpop.f32.mrf.mxu1 }
 0x20f   : > { %1032 = vst [vmem:[%s2118_s6 + $0x8] sm:$0xff] %v1016_v36  ;;  %1304 = vst [vmem:[#allocation2] sm:$0xff] %v1303_v41   ;;  %v1003_v33 = vmul.f32 %v1977_v39, %v969_v29  ;;  %v1051_v55 = vmul.f32 %v969_v29, %v1968_v31  ;;  %v1011_v58 = vmul.f32 %v1977_v39, %v977_v40  ;;  %v996_v31 = vld [vmem:[%s2118_s6 + $0x78] sm:$0xff] }
 0x210   : > { %1040 = vst [vmem:[%s2118_s6 + $0x48] sm:$0xff] %v1024_v42  ;;  %1350 = vst [vmem:[#allocation2 + $0x20] sm:$0xff] %v1323_v43   ;;  %v1059_v56 = vmul.f32 %v977_v40, %v1985_v48  ;;  %v1021_v61 = vadd.f32 %v1005_v50, %v987_v44  ;;  %v1029_v62 = vadd.f32 %v1013_v52, %v995_v45 }
 0x211   : > { %v972_v63 = vmul.f32 %v1481_v46, %v1974_v34  ;;  %v980_v0 = vmul.f32 %v1489_v47, %v963_v49  ;;  %v1019_v1 = vadd.f32 %v1003_v33, %v985_v54  ;;  %v1027_v2 = vadd.f32 %v1011_v58, %v993_v57 }
 0x212   : > { %v970_v4 = vmul.f32 %v1970_v32, %v841_v59  ;;  %v978_v48 = vmul.f32 %v2003_v7, %v873_v60  ;;  %1037 = vst [vmem:[%s2118_s6 + $0x30] sm:$0xff] %v1021_v61  ;;  %1045 = vst [vmem:[%s2118_s6 + $0x70] sm:$0xff] %v1029_v62 }
 0x213   : > { %v1006_v5 = vmul.f32 %v1977_v39, %v972_v63  ;;  %v1054_v6 = vmul.f32 %v972_v63, %v1974_v34  ;;  %v1014_v8 = vmul.f32 %v1977_v39, %v980_v0  ;;  %v1062_v9 = vmul.f32 %v980_v0, %v963_v49  ;;  %1035 = vst [vmem:[%s2118_s6 + $0x20] sm:$0xff] %v1019_v1 }
 0x214   : > { %1043 = vst [vmem:[%s2118_s6 + $0x60] sm:$0xff] %v1027_v2  ;;  %v1004_v34 = vmul.f32 %v1977_v39, %v970_v4  ;;  %v1052_v12 = vmul.f32 %v970_v4, %v1970_v32  ;;  %v1012_v13 = vmul.f32 %v1977_v39, %v978_v48  ;;  %v1060_v14 = vmul.f32 %v978_v48, %v2003_v7 }
 0x215   : > { %v1022_v15 = vadd.f32 %v1006_v5, %v988_v3  ;;  %v1318_v16 = vpack.c.bf16 %v1054_v6, %v1053_v51  ;;  %v1030_v17 = vadd.f32 %v1014_v8, %v996_v31  ;;  %v1338_v18 = vpack.c.bf16 %v1062_v9, %v1061_v53 }
 0x216   : > { %v1020_v19 = vadd.f32 %v1004_v34, %v986_v10  ;;  %v1313_v20 = vpack.c.bf16 %v1052_v12, %v1051_v55  ;;  %v1028_v21 = vadd.f32 %v1012_v13, %v994_v11  ;;  %v1333_v22 = vpack.c.bf16 %v1060_v14, %v1059_v56 }
 0x217   : > { %1038 = vst [vmem:[%s2118_s6 + $0x38] sm:$0xff] %v1022_v15  ;;  %1349 = vst [vmem:[#allocation2 + $0x18] sm:$0xff] %v1318_v16  }
 0x218   : > { %1046 = vst [vmem:[%s2118_s6 + $0x78] sm:$0xff] %v1030_v17  ;;  %1353 = vst [vmem:[#allocation2 + $0x38] sm:$0xff] %v1338_v18  }
 0x219   : > { %1036 = vst [vmem:[%s2118_s6 + $0x28] sm:$0xff] %v1020_v19  ;;  %1348 = vst [vmem:[#allocation2 + $0x10] sm:$0xff] %v1313_v20  }
 0x21a   : > { %1044 = vst [vmem:[%s2118_s6 + $0x68] sm:$0xff] %v1028_v21  ;;  %1352 = vst [vmem:[#allocation2 + $0x30] sm:$0xff] %v1333_v22  }
 0x21b PF: > { %s17_s21 = sadd.s32 1, %s1604_s21  }
 0x21c   : > { %p14_p1 = scmp.ge.s32.totalorder %s17_s21, 4  }
 0x21e   :  { %16 = sbr.rel (!%p14_p1) target bundleno = 1 (0x1), region = 76 }
 0x223   :  { %1154 = vsyncpa [#allocation4], 1 }
 0x224   :  { %1156 = vsyncpa [#allocation4 + $0x1], 1 }

</bundles_post_ra>
